<compile_context>
chip_gen: v6e
topology: v6e:2x2x1
jax: 0.10.0
libtpu: 0.0.40
codegen_flags: <defaults>
</compile_context>

<pallas_src>
import math
import jax
import jax.numpy as jnp
from jax.experimental import pallas as pl
from jax.experimental.pallas import tpu as pltpu

LANE = 128          # lane width / padded fc3 output width
HIDDEN = 128        # fc1/fc2 width (native to the module)
N_ACTIONS = 4       # fc3 width (un-padded)
BM_MAX = 512        # max batch rows per grid step


def dqn_kernel(x_ref, w1_ref, b1_ref, w2_ref, b2_ref, w3_ref, b3_ref, o_ref):
    # x: (BM, K) f32 -> cast to bf16 in-kernel.  Weights bf16 (in, out).
    # Biases f32 (1, out).  MXU matmuls with f32 accumulation; bias-add/ReLU in f32.
    x = x_ref[...].astype(jnp.bfloat16)
    h1 = jnp.dot(x, w1_ref[...], preferred_element_type=jnp.float32) + b1_ref[...]
    h1 = jnp.maximum(h1, 0.0)                                   # ReLU (f32, VPU)
    h2 = jnp.dot(h1.astype(jnp.bfloat16), w2_ref[...],
                 preferred_element_type=jnp.float32) + b2_ref[...]
    h2 = jnp.maximum(h2, 0.0)                                   # ReLU (f32, VPU)
    y = jnp.dot(h2.astype(jnp.bfloat16), w3_ref[...],
                preferred_element_type=jnp.float32) + b3_ref[...]
    o_ref[...] = y.astype(o_ref.dtype)                          # bf16 writeback


def _round_up(n, m):
    return ((n + m - 1) // m) * m


def _batch_tiling(batch):
    """Pick (block_rows, padded_batch): one big step for small batches, 512-row tiles above."""
    if batch <= BM_MAX:
        bm = max(_round_up(batch, 8), 8)
        return bm, bm
    return BM_MAX, _round_up(batch, BM_MAX)


def pad_params(params):
    """Cast f32 (in,out) params to the bf16 layout the kernel expects (fc3 lane-padded)."""
    def pad_cols(a, cols):
        return jnp.zeros((a.shape[0], cols), a.dtype).at[:, :a.shape[1]].set(a)

    return {
        "w1": params["w1"].astype(jnp.bfloat16),                    # (K, 128)   no K pad
        "b1": params["b1"].astype(jnp.float32),                     # (1, 128)
        "w2": params["w2"].astype(jnp.bfloat16),                    # (128, 128)
        "b2": params["b2"].astype(jnp.float32),                     # (1, 128)
        "w3": pad_cols(params["w3"], LANE).astype(jnp.bfloat16),    # (128, 128) zero cols >= 4
        "b3": pad_cols(params["b3"], LANE).astype(jnp.float32),     # (1, 128)   zero cols >= 4
    }


@jax.jit
def deep_q_network_forward(x, p):
    """x: (B, input_size) f32.  p: bf16/lane-padded params from pad_params()."""
    B, in_size = x.shape
    bm, b_pad = _batch_tiling(B)
    if b_pad != B:  # minimal batch-row pad only (no feature-dim pad, no full copy otherwise)
        x = jnp.pad(x, ((0, b_pad - B), (0, 0)))

    resident = lambda shape: pl.BlockSpec(shape, lambda i: (0, 0))  # VMEM-resident across grid

    flops = 2 * b_pad * (in_size * HIDDEN + HIDDEN * HIDDEN + HIDDEN * LANE)
    bytes_accessed = (
        b_pad * in_size * 4                                              # x (f32)
        + (in_size * HIDDEN + HIDDEN * HIDDEN + HIDDEN * LANE) * 2       # weights (bf16)
        + (HIDDEN + HIDDEN + LANE) * 4                                   # biases (f32)
        + b_pad * LANE * 2                                               # output (bf16)
    )

    out = pl.pallas_call(
        dqn_kernel,
        out_shape=jax.ShapeDtypeStruct((b_pad, LANE), jnp.bfloat16),
        grid=(b_pad // bm,),
        in_specs=[
            pl.BlockSpec((bm, in_size), lambda i: (i, 0)),   # x tile, pipelined over batch
            resident((in_size, HIDDEN)),                     # w1
            resident((1, HIDDEN)),                           # b1
            resident((HIDDEN, HIDDEN)),                      # w2
            resident((1, HIDDEN)),                           # b2
            resident((HIDDEN, LANE)),                        # w3 (lane-padded)
            resident((1, LANE)),                             # b3 (lane-padded)
        ],
        out_specs=pl.BlockSpec((bm, LANE), lambda i: (i, 0)),
        compiler_params=pltpu.CompilerParams(
            dimension_semantics=("parallel",)),
        cost_estimate=pl.CostEstimate(
            flops=flops, transcendentals=0, bytes_accessed=bytes_accessed),
    )(x, p["w1"], p["b1"], p["w2"], p["b2"], p["w3"], p["b3"])

    return out[:B, :N_ACTIONS].astype(jnp.float32)


def init_params(key, input_size, hidden=HIDDEN, n_actions=N_ACTIONS):
    """Deterministic PyTorch-style (uniform +/- 1/sqrt(fan_in)) init, f32, (in,out) layout."""
    def linear(key, fan_in, fan_out):
        kw, kb = jax.random.split(key)
        bound = 1.0 / math.sqrt(fan_in)
        w = jax.random.uniform(kw, (fan_in, fan_out), jnp.float32, -bound, bound)
        b = jax.random.uniform(kb, (1, fan_out), jnp.float32, -bound, bound)
        return w, b

    k1, k2, k3 = jax.random.split(key, 3)
    w1, b1 = linear(k1, input_size, hidden)
    w2, b2 = linear(k2, hidden, hidden)
    w3, b3 = linear(k3, hidden, n_actions)
    return {"w1": w1, "b1": b1, "w2": w2, "b2": b2, "w3": w3, "b3": b3}


def reference_forward_matched(x, p):
    """Pure-JAX reference with the same bf16-input / f32-accumulate precision as the kernel."""
    w1 = p["w1"].astype(jnp.bfloat16)
    w2 = p["w2"].astype(jnp.bfloat16)
    w3 = p["w3"].astype(jnp.bfloat16)
    h1 = jnp.maximum(jnp.dot(x.astype(jnp.bfloat16), w1,
                             preferred_element_type=jnp.float32) + p["b1"], 0.0)
    h2 = jnp.maximum(jnp.dot(h1.astype(jnp.bfloat16), w2,
                             preferred_element_type=jnp.float32) + p["b2"], 0.0)
    return jnp.dot(h2.astype(jnp.bfloat16), w3,
                   preferred_element_type=jnp.float32) + p["b3"]


if __name__ == "__main__":
    key = jax.random.PRNGKey(0)
    k_x, k_p = jax.random.split(key)

    batch = 4            # small demo batch (kernel pads rows to a multiple of 8)
    input_size = 16      # input_Size of the DQN state vector

    x = jax.random.normal(k_x, (batch, input_size), jnp.float32)
    params = init_params(k_p, input_size)
    padded = pad_params(params)

    out = deep_q_network_forward(x, padded)
    out = jax.block_until_ready(out)

    ref = reference_forward_matched(x, params)
    assert out.shape == (batch, N_ACTIONS)
    # Kernel additionally rounds the final result through bf16; allow that rounding.
    assert jnp.allclose(out, ref, atol=2e-2, rtol=2e-2), \
        f"max abs err {jnp.max(jnp.abs(out - ref))}"

    print("KERNEL_OK")
</pallas_src>

<mosaic_0001>
module attributes {stable_mosaic.version = 11 : i64} {
  func.func @dqn_kernel(%arg0: i32, %arg1: memref<8x16xf32, #tpu.memory_space<vmem>>, %arg2: memref<16x128xbf16, #tpu.memory_space<vmem>>, %arg3: memref<1x128xf32, #tpu.memory_space<vmem>>, %arg4: memref<128x128xbf16, #tpu.memory_space<vmem>>, %arg5: memref<1x128xf32, #tpu.memory_space<vmem>>, %arg6: memref<128x128xbf16, #tpu.memory_space<vmem>>, %arg7: memref<1x128xf32, #tpu.memory_space<vmem>>, %arg8: memref<8x128xbf16, #tpu.memory_space<vmem>>) attributes {dimension_semantics = [#tpu.dimension_semantics<parallel>], iteration_bounds = array<i64: 1>, scalar_prefetch = 0 : i64, scratch_operands = 0 : i64, tpu.core_type = #tpu.core_type<tc>, window_params = [{transform_indices = @transform_0, window_bounds = array<i64: 8, 16>}, {pipeline_mode = #tpu.pipeline_mode<synchronous>, transform_indices = @transform_1, window_bounds = array<i64: 16, 128>}, {pipeline_mode = #tpu.pipeline_mode<synchronous>, transform_indices = @transform_2, window_bounds = array<i64: 1, 128>}, {pipeline_mode = #tpu.pipeline_mode<synchronous>, transform_indices = @transform_3, window_bounds = array<i64: 128, 128>}, {pipeline_mode = #tpu.pipeline_mode<synchronous>, transform_indices = @transform_4, window_bounds = array<i64: 1, 128>}, {pipeline_mode = #tpu.pipeline_mode<synchronous>, transform_indices = @transform_5, window_bounds = array<i64: 128, 128>}, {pipeline_mode = #tpu.pipeline_mode<synchronous>, transform_indices = @transform_6, window_bounds = array<i64: 1, 128>}, {transform_indices = @transform_7, window_bounds = array<i64: 8, 128>}]} {
    %c0 = arith.constant 0 : index
    %c0_0 = arith.constant 0 : index
    %0 = vector.load %arg1[%c0, %c0_0] : memref<8x16xf32, #tpu.memory_space<vmem>>, vector<8x16xf32>
    %1 = arith.truncf %0 : vector<8x16xf32> to vector<8x16xbf16>
    %c0_1 = arith.constant 0 : index
    %c0_2 = arith.constant 0 : index
    %2 = vector.load %arg2[%c0_1, %c0_2] : memref<16x128xbf16, #tpu.memory_space<vmem>>, vector<16x128xbf16>
    %cst = arith.constant dense<0.000000e+00> : vector<8x128xf32>
    %3 = tpu.matmul %1, %2, %cst {dimension_numbers = #tpu.dot_dimension_numbers<[1], [0], [0], [1], [0, 0, 1, 1], [], []>} : vector<8x16xbf16>, vector<16x128xbf16>, vector<8x128xf32> -> vector<8x128xf32>
    %c0_3 = arith.constant 0 : index
    %c0_4 = arith.constant 0 : index
    %4 = vector.load %arg3[%c0_3, %c0_4] : memref<1x128xf32, #tpu.memory_space<vmem>>, vector<1x128xf32>
    %5 = vector.broadcast %4 : vector<1x128xf32> to vector<8x128xf32>
    %6 = arith.addf %3, %5 : vector<8x128xf32>
    %cst_5 = arith.constant 0.000000e+00 : f32
    %7 = vector.broadcast %cst_5 : f32 to vector<8x128xf32>
    %8 = arith.maximumf %6, %7 : vector<8x128xf32>
    %9 = arith.truncf %8 : vector<8x128xf32> to vector<8x128xbf16>
    %c0_6 = arith.constant 0 : index
    %c0_7 = arith.constant 0 : index
    %10 = vector.load %arg4[%c0_6, %c0_7] : memref<128x128xbf16, #tpu.memory_space<vmem>>, vector<128x128xbf16>
    %cst_8 = arith.constant dense<0.000000e+00> : vector<8x128xf32>
    %11 = tpu.matmul %9, %10, %cst_8 {dimension_numbers = #tpu.dot_dimension_numbers<[1], [0], [0], [1], [0, 0, 1, 1], [], []>} : vector<8x128xbf16>, vector<128x128xbf16>, vector<8x128xf32> -> vector<8x128xf32>
    %c0_9 = arith.constant 0 : index
    %c0_10 = arith.constant 0 : index
    %12 = vector.load %arg5[%c0_9, %c0_10] : memref<1x128xf32, #tpu.memory_space<vmem>>, vector<1x128xf32>
    %13 = vector.broadcast %12 : vector<1x128xf32> to vector<8x128xf32>
    %14 = arith.addf %11, %13 : vector<8x128xf32>
    %cst_11 = arith.constant 0.000000e+00 : f32
    %15 = vector.broadcast %cst_11 : f32 to vector<8x128xf32>
    %16 = arith.maximumf %14, %15 : vector<8x128xf32>
    %17 = arith.truncf %16 : vector<8x128xf32> to vector<8x128xbf16>
    %c0_12 = arith.constant 0 : index
    %c0_13 = arith.constant 0 : index
    %18 = vector.load %arg6[%c0_12, %c0_13] : memref<128x128xbf16, #tpu.memory_space<vmem>>, vector<128x128xbf16>
    %cst_14 = arith.constant dense<0.000000e+00> : vector<8x128xf32>
    %19 = tpu.matmul %17, %18, %cst_14 {dimension_numbers = #tpu.dot_dimension_numbers<[1], [0], [0], [1], [0, 0, 1, 1], [], []>} : vector<8x128xbf16>, vector<128x128xbf16>, vector<8x128xf32> -> vector<8x128xf32>
    %c0_15 = arith.constant 0 : index
    %c0_16 = arith.constant 0 : index
    %20 = vector.load %arg7[%c0_15, %c0_16] : memref<1x128xf32, #tpu.memory_space<vmem>>, vector<1x128xf32>
    %21 = vector.broadcast %20 : vector<1x128xf32> to vector<8x128xf32>
    %22 = arith.addf %19, %21 : vector<8x128xf32>
    %23 = arith.truncf %22 : vector<8x128xf32> to vector<8x128xbf16>
    %c0_17 = arith.constant 0 : index
    %c0_18 = arith.constant 0 : index
    %24 = vector.load %arg8[%c0_17, %c0_18] : memref<8x128xbf16, #tpu.memory_space<vmem>>, vector<8x128xbf16>
    tpu.vector_store %arg8[%c0_17, %c0_18], %23 {strides = array<i32>} : memref<8x128xbf16, #tpu.memory_space<vmem>>, vector<8x128xbf16>,
    return
  }
  func.func @transform_0(%arg0: i32) -> (i32, i32) {
    %c0_i32 = arith.constant 0 : i32
    %c0_i32_0 = arith.constant 0 : i32
    return %arg0, %c0_i32 : i32, i32
  }
  func.func @transform_1(%arg0: i32) -> (i32, i32) {
    %c0_i32 = arith.constant 0 : i32
    %c0_i32_0 = arith.constant 0 : i32
    %c0_i32_1 = arith.constant 0 : i32
    return %c0_i32, %c0_i32_0 : i32, i32
  }
  func.func @transform_2(%arg0: i32) -> (i32, i32) {
    %c0_i32 = arith.constant 0 : i32
    %c0_i32_0 = arith.constant 0 : i32
    %c0_i32_1 = arith.constant 0 : i32
    return %c0_i32, %c0_i32_0 : i32, i32
  }
  func.func @transform_3(%arg0: i32) -> (i32, i32) {
    %c0_i32 = arith.constant 0 : i32
    %c0_i32_0 = arith.constant 0 : i32
    %c0_i32_1 = arith.constant 0 : i32
    return %c0_i32, %c0_i32_0 : i32, i32
  }
  func.func @transform_4(%arg0: i32) -> (i32, i32) {
    %c0_i32 = arith.constant 0 : i32
    %c0_i32_0 = arith.constant 0 : i32
    %c0_i32_1 = arith.constant 0 : i32
    return %c0_i32, %c0_i32_0 : i32, i32
  }
  func.func @transform_5(%arg0: i32) -> (i32, i32) {
    %c0_i32 = arith.constant 0 : i32
    %c0_i32_0 = arith.constant 0 : i32
    %c0_i32_1 = arith.constant 0 : i32
    return %c0_i32, %c0_i32_0 : i32, i32
  }
  func.func @transform_6(%arg0: i32) -> (i32, i32) {
    %c0_i32 = arith.constant 0 : i32
    %c0_i32_0 = arith.constant 0 : i32
    %c0_i32_1 = arith.constant 0 : i32
    return %c0_i32, %c0_i32_0 : i32, i32
  }
  func.func @transform_7(%arg0: i32) -> (i32, i32) {
    %c0_i32 = arith.constant 0 : i32
    %c0_i32_0 = arith.constant 0 : i32
    return %arg0, %c0_i32 : i32, i32
  }
}

</mosaic_0001>

<bundles_post_ra>
// kernel: deep_q_network_forward.1
= control target key start
LH: loop header
LB: loop body
LE: loop exit
PB: predicated region body
PF: predicated region fallthrough
CT: control target
= control target key end

     0   :  { %12 = vsyncpa [#allocation3], 0  ;;  %s594_s0 = inlined_call_operand.vmem [shape: f32[8,16], index: 0, kind: input, shape index: {}]   ;;  %s595_s1 = inlined_call_operand.vmem [shape: bf16[16,128], index: 1, kind: input, shape index: {}]   ;;  %s596_s2 = inlined_call_operand.vmem [shape: f32[1,128], index: 2, kind: input, shape index: {}]   ;;  %s597_s3 = inlined_call_operand.hbm [shape: bf16[128,128], index: 3, kind: input, shape index: {}]   ;;  %s598_s4 = inlined_call_operand.vmem [shape: f32[1,128], index: 4, kind: input, shape index: {}]   ;;  %s599_s5 = inlined_call_operand.hbm [shape: bf16[128,128], index: 5, kind: input, shape index: {}]   ;;  %s600_s6 = inlined_call_operand.vmem [shape: f32[1,128], index: 6, kind: input, shape index: {}]   ;;  %s601_s7 = inlined_call_operand.vmem [shape: bf16[8,128], index: 7, kind: output, shape index: {}]  }
   0x1   :  { %13 = vsyncpa [#allocation5], 0  ;;  %s504_s24 = smov [#allocation2]  }
   0x2   :  { %s25_s25 = sshll.u32 %s504_s24, 4  ;;  %s26_s25 = int_to_ptr.vmem [resolvable:$true] %s25_s25 }
   0x3   :  { %s468_s26 = scalar_lea.vmem %s26_s25, 1024  ;;  %p473_p1 = scmp.lt.s32.totalorder %s26_s25, %s26_s25 }
   0x4   :  { %p469_p0 = scmp.ne.s32.totalorder %s26_s25, %s468_s26  ;;  %p474_p2 = scmp.lt.s32.totalorder %s468_s26, %s468_s26 }
   0x6   :  { %p475_p3 = por %p474_p2, %p473_p1 }
   0x8   :  { %p476_p4 = pnand %p475_p3, %p469_p0 }
   0xa   :  { %479 = shalt.err (!%p476_p4)
}
   0xb   :  { %s505_s27 = smov 64   ;;  %s506_s28 = smov 4  }
   0xc   :  { %31 = dma.hbm_to_vmem [thread:$0]  %s597_s3, 1024, %s26_s25, [#allocation3], %s505_s27, %s505_s27, %s506_s28  }
   0xd   :  { %s507_s8 = smov [#allocation4]  }
   0xe   :  { %s39_s9 = sshll.u32 %s507_s8, 4  ;;  %s40_s9 = int_to_ptr.vmem [resolvable:$true] %s39_s9 }
   0xf   :  { %s488_s10 = scalar_lea.vmem %s40_s9, 1024  ;;  %p493_p6 = scmp.lt.s32.totalorder %s40_s9, %s40_s9 }
  0x10   :  { %p489_p5 = scmp.ne.s32.totalorder %s40_s9, %s488_s10  ;;  %p494_p7 = scmp.lt.s32.totalorder %s488_s10, %s488_s10 }
  0x12   :  { %p495_p8 = por %p494_p7, %p493_p6 }
  0x14   :  { %p496_p9 = pnand %p495_p8, %p489_p5 }
  0x16   :  { %499 = shalt.err (!%p496_p9)
}
  0x17   :  { %45 = dma.hbm_to_vmem [thread:$0]  %s599_s5, 1024, %s40_s9, [#allocation5], %s505_s27, %s505_s27, %s506_s28  }
  0x18   :  { %500 = dma.done.wait [#allocation3], 1024  }
  0x19   :  { %501 = vsyncadd [#allocation3], 4294966272 }
  0x1a   :  { %502 = dma.done.wait [#allocation5], 1024  }
  0x1b   :  { %503 = vsyncadd [#allocation5], 4294966272  ;;  %v508_v0 = vmov 0.0   ;;  %vm509_vm0 = vmmov 0   ;;  %v443_v1 = vld [vmem:[%s595_s1] sm:$0xff]   ;;  %vm72_vm1 = vcmask 130048  }
  0x1c   :  { %391 = vmatprep.subr.bf16.mxu0 %v508_v0  ;;  %393 = vmatprep.mubr.msk.bf16.mxu0 %vm509_vm0, %v508_v0  ;;  %v55_v2 = vld [vmem:[%s594_s0] sm:$0xff]  ;;  %v444_v4 = vld [vmem:[#allocation2 + $0x38] sm:$0xff]   ;;  %v445_v5 = vld [vmem:[#allocation2 + $0x30] sm:$0xff]  }
  0x1d   :  { %397 = vmatprep.subr.bf16.mxu1 %v508_v0  ;;  %413 = vmatprep.mubr.msk.bf16.mxu1 %vm509_vm0, %v508_v0  ;;  %v56_v3 = vpack.c.bf16 %v55_v2, %v55_v2  ;;  %v446_v6 = vld [vmem:[#allocation2 + $0x28] sm:$0xff]   ;;  %v447_v7 = vld [vmem:[#allocation2 + $0x20] sm:$0xff]   ;;  %v448_v8 = vld [vmem:[#allocation2 + $0x18] sm:$0xff]  }
  0x1e   :  { %392 = vmatpush3.bf16.msra.mxu0 %v443_v1  ;;  %398 = vmatpush3.bf16.msra.mxu1 %v444_v4  ;;  %v449_v9 = vld [vmem:[#allocation2 + $0x10] sm:$0xff]   ;;  %v450_v10 = vld [vmem:[#allocation2 + $0x8] sm:$0xff]   ;;  %v451_v11 = vld [vmem:[#allocation2] sm:$0xff]  }
  0x1f   :  { %417 = vmatprep.subr.bf16.mxu0 %v508_v0  ;;  %399 = vmatprep.subr.bf16.mxu1 %v508_v0  ;;  %v452_v12 = vld [vmem:[#allocation4 + $0x38] sm:$0xff]   ;;  %v453_v13 = vld [vmem:[#allocation4 + $0x30] sm:$0xff]   ;;  %v454_v14 = vld [vmem:[#allocation4 + $0x28] sm:$0xff]  }
  0x20   :  { %v455_v15 = vld [vmem:[#allocation4 + $0x20] sm:$0xff]   ;;  %v456_v16 = vld [vmem:[#allocation4 + $0x18] sm:$0xff]   ;;  %v457_v17 = vld [vmem:[#allocation4 + $0x10] sm:$0xff]  }
  0x21   :  { %394 = vmatmul.mubr.msk.bf16.vlgmr.msra.gmra.mxu0 %vm72_vm1, %v56_v3  ;;  %v350_v18 = vld [vmem:[%s596_s2] ss:$0 sm:$0xff]  ;;  %v458_v26 = vld [vmem:[#allocation4 + $0x8] sm:$0xff]  }
  0x22   :  { %433 = vmatprep.mubr.msk.bf16.mxu0 %vm509_vm0, %v508_v0  ;;  %400 = vmatpush3.bf16.msra.mxu1 %v445_v5  ;;  %v459_v27 = vld [vmem:[#allocation4] sm:$0xff]  }
  0x23   :  { %401 = vmatprep.subr.bf16.mxu1 %v508_v0  ;;  %418 = vmatpush3.bf16.msra.mxu0 %v452_v12  ;;  %v353_v28 = vld [vmem:[%s598_s4] ss:$0 sm:$0xff] }
  0x24   :  { %419 = vmatprep.subr.bf16.mxu0 %v508_v0  ;;  %v362_v36 = vld [vmem:[%s600_s6] ss:$0 sm:$0xff] }
  0x26   :  { %402 = vmatpush3.bf16.msra.mxu1 %v446_v6 }
  0x27   :  { %403 = vmatprep.subr.bf16.mxu1 %v508_v0  ;;  %420 = vmatpush3.bf16.msra.mxu0 %v453_v13 }
  0x28   :  { %421 = vmatprep.subr.bf16.mxu0 %v508_v0 }
  0x2a   :  { %404 = vmatpush3.bf16.msra.mxu1 %v447_v7 }
  0x2b   :  { %405 = vmatprep.subr.bf16.mxu1 %v508_v0  ;;  %422 = vmatpush3.bf16.msra.mxu0 %v454_v14 }
  0x2c   :  { %423 = vmatprep.subr.bf16.mxu0 %v508_v0 }
  0x2e   :  { %406 = vmatpush3.bf16.msra.mxu1 %v448_v8 }
  0x2f   :  { %407 = vmatprep.subr.bf16.mxu1 %v508_v0  ;;  %424 = vmatpush3.bf16.msra.mxu0 %v455_v15 }
  0x30   :  { %425 = vmatprep.subr.bf16.mxu0 %v508_v0 }
  0x32   :  { %408 = vmatpush3.bf16.msra.mxu1 %v449_v9 }
  0x33   :  { %409 = vmatprep.subr.bf16.mxu1 %v508_v0  ;;  %426 = vmatpush3.bf16.msra.mxu0 %v456_v16 }
  0x34   :  { %427 = vmatprep.subr.bf16.mxu0 %v508_v0 }
  0x36   :  { %410 = vmatpush3.bf16.msra.mxu1 %v450_v10 }
  0x37   :  { %411 = vmatprep.subr.bf16.mxu1 %v508_v0  ;;  %428 = vmatpush3.bf16.msra.mxu0 %v457_v17 }
  0x38   :  { %429 = vmatprep.subr.bf16.mxu0 %v508_v0 }
  0x3a   :  { %412 = vmatpush3.bf16.msra.mxu1 %v451_v11 }
  0x3b   :  { %430 = vmatpush3.bf16.msra.mxu0 %v458_v26 }
  0x3c   :  { %431 = vmatprep.subr.bf16.mxu0 %v508_v0 }
  0x3f   :  { %432 = vmatpush3.bf16.msra.mxu0 %v459_v27 }
  0xe1   :  { %v110_v19 = vpop.f32.mrf.mxu0 }
  0xe2   :  { %v111_v20 = vadd.f32 %v350_v18, %v110_v19 }
  0xe3   :  { %v395_v21 = vpop.f32.mrf.mxu0 }
  0xe4   :  { %v116_v22 = vmax.f32 %v111_v20, 0.0 }
  0xe5   :  { %v113_v23 = vpop.f32.mrf.mxu0 }
  0xe6   :  { %v117_v24 = vpack.c.bf16 %v116_v22, %v116_v22 }
  0xe7   :  { %v396_v25 = vpop.f32.mrf.mxu0 }
  0xe8   :  { %414 = vmatmul.mubr.bf16.vlgmr.msra.gmra.mxu1 %v117_v24 }
 0x1a8   :  { %v223_v29 = vpop.f32.mrf.mxu1 }
 0x1a9   :  { %v224_v30 = vadd.f32 %v353_v28, %v223_v29 }
 0x1aa   :  { %v415_v31 = vpop.f32.mrf.mxu1 }
 0x1ab   :  { %v229_v32 = vmax.f32 %v224_v30, 0.0 }
 0x1ac   :  { %v226_v33 = vpop.f32.mrf.mxu1 }
 0x1ad   :  { %v230_v34 = vpack.c.bf16 %v229_v32, %v229_v32 }
 0x1ae   :  { %v416_v35 = vpop.f32.mrf.mxu1 }
 0x1af   :  { %434 = vmatmul.mubr.bf16.vlgmr.msra.gmra.mxu0 %v230_v34 }
 0x26f   :  { %v336_v37 = vpop.f32.mrf.mxu0 }
 0x270   :  { %v337_v38 = vadd.f32 %v362_v36, %v336_v37 }
 0x271   :  { %v435_v39 = vpop.f32.mrf.mxu0 }
 0x272   :  { %v342_v40 = vpack.c.bf16 %v337_v38, %v337_v38 }
 0x273   :  { %v339_v41 = vpop.f32.mrf.mxu0 }
 0x274   :  { %343 = vst [vmem:[%s601_s7] sm:$0xf] %v342_v40 }
 0x275   :  { %v436_v42 = vpop.f32.mrf.mxu0 }
 0x276   :  { %348 = vsyncpa [#allocation3], 1 }
 0x277   :  { %349 = vsyncpa [#allocation5], 1 }

</bundles_post_ra>
